<compile_context>
chip_gen: v6e
topology: v6e:2x2x1
jax: 0.10.0
libtpu: 0.0.40
codegen_flags: <defaults>
</compile_context>

<pallas_src>
import functools

import jax
import jax.numpy as jnp
from jax.experimental import pallas as pl
from jax.experimental.pallas import tpu as pltpu


def _cdiv(a, b):
    return -(-a // b)


def _round_up(x, m):
    return ((x + m - 1) // m) * m


@functools.lru_cache(maxsize=None)
def _vmem_limit_bytes():
    """Generation-aware VMEM budget (v5e/v6e: 128 MiB physical, v7x: 64 MiB per TC)."""
    cap = 0
    try:
        cap = int(pltpu.get_tpu_info().vmem_capacity_bytes)
    except Exception:
        cap = 0
    if cap <= 0:
        cap = 64 * 1024 * 1024            # conservative fallback = v7x per-TC VMEM
    # 3/4 of capacity, clamped to a sane range, leaving headroom for compiler scratch.
    return max(32 * 1024 * 1024, min((cap * 3) // 4, 100 * 1024 * 1024))


# --------------------------- single-pass fast path -----------------------------------


def _make_fused_kernel(true_d):
    """Whole feature matrix resident: one DMA in, reduce + finalize + apply, one DMA out."""
    inv_d = 1.0 / float(true_d)

    def kernel(x_hbm, gamma_ref, beta_ref, o_hbm, buf):
        pltpu.sync_copy(x_hbm, buf)                              # HBM -> VMEM (one DMA)
        x = buf[...].astype(jnp.float32)                         # (N, Dp)
        ss = jnp.sum(x * x, axis=0, keepdims=True)               # (1, Dp)
        gx = jnp.sqrt(ss)                                        # L2 norm over rows
        denom = jnp.sum(gx, axis=-1, keepdims=True) * inv_d + 1e-6   # mean over TRUE D
        nx = gx * pl.reciprocal(denom, approx=False)
        scale = gamma_ref[...] * nx + 1.0                        # gamma*Nx + 1
        buf[...] = (x * scale + beta_ref[...]).astype(buf.dtype)  # reuse the input buffer
        pltpu.sync_copy(buf, o_hbm)                              # VMEM -> HBM (one DMA)

    return kernel


# --------------------------- two-pass streaming path ---------------------------------


def _make_partial_sumsq_kernel(n_rows, tile_n, d_pad, steps_per_split, may_mask):
    """Pass 1: per-split per-channel sum of squares, accumulated in an (8, Dp) scratch."""

    def kernel(x_ref, part_ref, ss_ref):
        s = pl.program_id(0)          # split (maps to a TensorCore on v7x)
        j = pl.program_id(1)          # step within the split

        @pl.when(j == 0)
        def _init():
            ss_ref[...] = jnp.zeros_like(ss_ref)

        x = x_ref[...].astype(jnp.float32)                      # (tile_n, Dp)

        def _accumulate(xv):
            # Sublane-aligned partial sums: (tile_n, Dp) -> (8, Dp) with plain VPU adds;
            # the single 8->1 cross-sublane reduce happens once per split in the epilogue.
            x2 = xv * xv
            ss_ref[...] += jnp.sum(x2.reshape(tile_n // 8, 8, d_pad), axis=0)

        if may_mask:
            start = (s * steps_per_split + j) * tile_n
            needs_mask = start + tile_n > n_rows

            @pl.when(needs_mask)       # only the overhanging tile(s) pay for the mask
            def _masked():
                row = jax.lax.broadcasted_iota(jnp.int32, (tile_n, 1), 0) + start
                _accumulate(jnp.where(row < n_rows, x, 0.0))

            @pl.when(jnp.logical_not(needs_mask))
            def _unmasked():
                _accumulate(x)
        else:
            _accumulate(x)

        @pl.when(j == pl.num_programs(1) - 1)
        def _finalize():
            part_ref[...] = jnp.sum(ss_ref[...], axis=0, keepdims=True)   # (1, Dp)

    return kernel


def _make_apply_kernel(true_d):
    """Pass 2: combine partials, finalize scale = gamma*Nx + 1, apply out = x*scale + beta."""
    inv_d = 1.0 / float(true_d)

    def kernel(part_ref, gamma_ref, beta_ref, x_ref, o_ref):
        # Tiny (1, Dp) epilogue recomputed per step; negligible vs. the tile DMA and it
        # keeps the pass core-parallel safe (no step-0-only scratch init).
        ss = jnp.sum(part_ref[...], axis=0, keepdims=True)       # (1, Dp)
        gx = jnp.sqrt(ss)
        denom = jnp.sum(gx, axis=-1, keepdims=True) * inv_d + 1e-6
        nx = gx * pl.reciprocal(denom, approx=False)
        scale = gamma_ref[...] * nx + 1.0
        x = x_ref[...].astype(jnp.float32)
        o_ref[...] = (x * scale + beta_ref[...]).astype(o_ref.dtype)

    return kernel


# ------------------------------------ wrapper -----------------------------------------


def minkowski_grn(feats, gamma, beta, *, tile_n=None, force_two_pass=False):
    """GRN over sparse-tensor features.

    feats: (N, D) float array (the x.F feature matrix)
    gamma, beta: (1, D) parameters
    """
    N, D = feats.shape
    gamma = jnp.reshape(gamma, (1, D)).astype(jnp.float32)
    beta = jnp.reshape(beta, (1, D)).astype(jnp.float32)

    # Lane-dense layout: pad channels to a multiple of 128 so stores are unmasked full-lane
    # vst.  Padded lanes have zero feats/gamma/beta and the epilogue divides by the true D,
    # so they contribute nothing and are sliced off afterwards.
    Dp = _round_up(D, 128)
    if Dp != D:
        feats_p = jnp.pad(feats, ((0, 0), (0, Dp - D)))
        gamma_p = jnp.pad(gamma, ((0, 0), (0, Dp - D)))
        beta_p = jnp.pad(beta, ((0, 0), (0, Dp - D)))
    else:
        feats_p, gamma_p, beta_p = feats, gamma, beta

    itemsize = jnp.dtype(feats.dtype).itemsize
    packing = 8 * max(1, 4 // max(itemsize, 1))   # sublane packing: f32->8, bf16->16, int8->32
    vmem_limit = _vmem_limit_bytes()

    # ---- fast path: whole (padded) feature matrix resident in VMEM, single kernel ----
    # Single-buffered by construction (manual sync_copy + reused scratch); peak VMEM is
    # roughly feats + a few f32 temporaries, so gate on ~1/5 of the per-generation limit.
    fast_cap = vmem_limit // 5
    feats_f32_bytes = N * Dp * 4
    if (not force_two_pass) and feats_f32_bytes <= fast_cap:
        out = pl.pallas_call(
            _make_fused_kernel(D),
            out_shape=jax.ShapeDtypeStruct((N, Dp), feats.dtype),
            grid_spec=pltpu.PrefetchScalarGridSpec(
                num_scalar_prefetch=0,
                grid=(1,),
                in_specs=[
                    pl.BlockSpec(memory_space=pl.ANY),              # feats (stay in HBM)
                    pl.BlockSpec((1, Dp), lambda i: (0, 0)),        # gamma
                    pl.BlockSpec((1, Dp), lambda i: (0, 0)),        # beta
                ],
                out_specs=pl.BlockSpec(memory_space=pl.ANY),        # out (written via DMA)
                scratch_shapes=[pltpu.VMEM((N, Dp), feats.dtype)],  # single resident buffer
            ),
            compiler_params=pltpu.CompilerParams(
                dimension_semantics=("arbitrary",),
                vmem_limit_bytes=vmem_limit,
            ),
        )(feats_p, gamma_p, beta_p)
        return out if Dp == D else out[:, :D]

    # ---- two-pass streaming path ----
    budget = vmem_limit // 3
    if tile_n is not None:
        tile_target1 = tile_target2 = max(packing, int(tile_n))
    else:
        # Pass 1 only streams input tiles (its (1, Dp) output is resident) -> bigger tile.
        per_row1 = 2 * Dp * itemsize + 2 * Dp * 4             # 2x in buffers + f32 temps
        per_row2 = 4 * Dp * itemsize + 2 * Dp * 4             # 2x in + 2x out + f32 temps
        tile_target1 = max(packing, min(8192, budget // per_row1))
        tile_target2 = max(packing, min(8192, budget // per_row2))
    tile_target1 = (tile_target1 // packing) * packing
    tile_target2 = (tile_target2 // packing) * packing
    tile_target1 = min(tile_target1, _round_up(N, packing))
    tile_target2 = min(tile_target2, _round_up(N, packing))

    # --- pass 1: per-channel sum of squares, split 2 ways along a 'parallel' axis so the
    #     two v7x TensorCores each reduce half the rows (harmless on single-TC v5e/v6e). ---
    total_blocks = _cdiv(N, tile_target1)
    num_splits = 2 if total_blocks >= 2 else 1
    steps_per_split = _cdiv(total_blocks, num_splits)
    # Re-derive the tile so the rectangular (num_splits x steps) grid overhangs N by less
    # than one sublane group -> negligible wasted DMA when both splits run on one core.
    tile_n1 = min(_round_up(_cdiv(N, num_splits * steps_per_split), packing),
                  _round_up(N, packing))
    n_blocks1 = _cdiv(N, tile_n1)
    last_block1 = max(n_blocks1 - 1, 0)
    may_mask = num_splits * steps_per_split * tile_n1 > N

    def _feats1_index(s, j):
        # Clamp so a (rare) fully-overhanging grid step still issues an in-bounds DMA;
        # its data is zero-masked inside the kernel.
        return (jnp.minimum(s * steps_per_split + j, last_block1), 0)

    partials = pl.pallas_call(
        _make_partial_sumsq_kernel(N, tile_n1, Dp, steps_per_split, may_mask),
        out_shape=jax.ShapeDtypeStruct((num_splits, Dp), jnp.float32),
        grid_spec=pltpu.PrefetchScalarGridSpec(
            num_scalar_prefetch=0,
            grid=(num_splits, steps_per_split),
            in_specs=[pl.BlockSpec((tile_n1, Dp), _feats1_index)],          # feats tile
            out_specs=pl.BlockSpec((1, Dp), lambda s, j: (s, 0)),           # per-split partial
            scratch_shapes=[pltpu.VMEM((8, Dp), jnp.float32)],              # sublane partial sums
        ),
        compiler_params=pltpu.CompilerParams(
            dimension_semantics=("parallel", "arbitrary"),
            vmem_limit_bytes=vmem_limit,
        ),
    )(feats_p)

    # --- pass 2: out = x * (gamma*Nx + 1) + beta, tiled over rows ---
    tile_n2 = tile_target2
    grid_n2 = _cdiv(N, tile_n2)
    out = pl.pallas_call(
        _make_apply_kernel(D),
        out_shape=jax.ShapeDtypeStruct((N, Dp), feats.dtype),
        grid_spec=pltpu.PrefetchScalarGridSpec(
            num_scalar_prefetch=0,
            grid=(grid_n2,),
            in_specs=[
                pl.BlockSpec((num_splits, Dp), lambda i: (0, 0)),   # sum-of-squares partials
                pl.BlockSpec((1, Dp), lambda i: (0, 0)),            # gamma
                pl.BlockSpec((1, Dp), lambda i: (0, 0)),            # beta
                pl.BlockSpec((tile_n2, Dp), lambda i: (i, 0)),      # feats tile
            ],
            out_specs=pl.BlockSpec((tile_n2, Dp), lambda i: (i, 0)),
        ),
        compiler_params=pltpu.CompilerParams(
            dimension_semantics=("parallel",),
            vmem_limit_bytes=vmem_limit,
        ),
    )(partials, gamma_p, beta_p, feats_p)
    return out if Dp == D else out[:, :D]


def _reference(feats, gamma, beta):
    x = feats.astype(jnp.float32)
    g = jnp.reshape(gamma, (1, -1)).astype(jnp.float32)
    b = jnp.reshape(beta, (1, -1)).astype(jnp.float32)
    gx = jnp.sqrt(jnp.sum(x * x, axis=0, keepdims=True))
    nx = gx / (jnp.mean(gx, axis=-1, keepdims=True) + 1e-6)
    return (g * (x * nx) + b + x).astype(feats.dtype)


if __name__ == "__main__":
    key = jax.random.PRNGKey(0)
    k_g, k_b, k_x1, k_x2, k_x3, k_x4 = jax.random.split(key, 6)

    # Module __init__ uses zeros(1, dim) for gamma/beta; use deterministic nonzero values
    # so the GRN math is actually exercised.
    D = 128
    gamma = 0.1 * jax.random.normal(k_g, (1, D), dtype=jnp.float32)
    beta = 0.1 * jax.random.normal(k_b, (1, D), dtype=jnp.float32)

    # 1) Small f32 input -> single-pass resident-in-VMEM fast path.
    N1 = 256
    feats1 = jax.random.normal(k_x1, (N1, D), dtype=jnp.float32)
    out1 = jax.block_until_ready(minkowski_grn(feats1, gamma, beta))
    ref1 = _reference(feats1, gamma, beta)
    assert out1.shape == (N1, D) and out1.dtype == feats1.dtype
    assert jnp.allclose(out1, ref1, atol=1e-3, rtol=1e-3), "fast-path mismatch vs reference"

    # 2) Forced two-pass streaming path with a non-multiple row count: exercises the 2-way
    #    parallel split of pass 1, the gated last-tile mask and the scratch accumulator.
    N2 = 520
    feats2 = jax.random.normal(k_x2, (N2, D), dtype=jnp.float32)
    out2 = jax.block_until_ready(
        minkowski_grn(feats2, gamma, beta, tile_n=128, force_two_pass=True))
    ref2 = _reference(feats2, gamma, beta)
    assert out2.shape == (N2, D) and out2.dtype == feats2.dtype
    assert jnp.allclose(out2, ref2, atol=1e-3, rtol=1e-3), "two-pass mismatch vs reference"

    # 3) bf16 feats with a non-128-multiple channel count, fast path: exercises the
    #    lane-dense channel padding and the reused bf16 VMEM buffer.
    D3 = 96
    gamma3 = 0.1 * jax.random.normal(k_g, (1, D3), dtype=jnp.float32)
    beta3 = 0.1 * jax.random.normal(k_b, (1, D3), dtype=jnp.float32)
    N3 = 60
    feats3 = jax.random.normal(k_x3, (N3, D3), dtype=jnp.float32).astype(jnp.bfloat16)
    out3 = jax.block_until_ready(minkowski_grn(feats3, gamma3, beta3))
    ref3 = _reference(feats3, gamma3, beta3)
    assert out3.shape == (N3, D3) and out3.dtype == jnp.bfloat16
    assert jnp.allclose(out3.astype(jnp.float32), ref3.astype(jnp.float32),
                        atol=3e-2, rtol=3e-2), "padded bf16 fast-path mismatch"

    # 4) bf16, padded channels, forced two-pass: exercises dtype-aware sublane rounding
    #    (16-row granules) plus the masked partial tile in both passes.
    N4 = 300
    feats4 = jax.random.normal(k_x4, (N4, D3), dtype=jnp.float32).astype(jnp.bfloat16)
    out4 = jax.block_until_ready(
        minkowski_grn(feats4, gamma3, beta3, tile_n=64, force_two_pass=True))
    ref4 = _reference(feats4, gamma3, beta3)
    assert out4.shape == (N4, D3) and out4.dtype == jnp.bfloat16
    assert jnp.allclose(out4.astype(jnp.float32), ref4.astype(jnp.float32),
                        atol=3e-2, rtol=3e-2), "padded bf16 two-pass mismatch"

    # TODO(synk): SparseTensor coordinate_manager / coordinate_map_key bookkeeping has no
    # Pallas equivalent; only the (N, dim) feature-matrix compute is implemented.
    print("KERNEL_OK")
</pallas_src>

<mosaic_0001>
module attributes {stable_mosaic.version = 11 : i64} {
  func.func @kernel(%arg0: i32, %arg1: memref<256x128xf32, #tpu.memory_space<any>>, %arg2: memref<1x128xf32, #tpu.memory_space<vmem>>, %arg3: memref<1x128xf32, #tpu.memory_space<vmem>>, %arg4: memref<256x128xf32, #tpu.memory_space<any>>, %arg5: memref<256x128xf32, #tpu.memory_space<vmem>>) attributes {dimension_semantics = [#tpu.dimension_semantics<arbitrary>], iteration_bounds = array<i64: 1>, scalar_prefetch = 0 : i64, scratch_operands = 1 : i64, tpu.core_type = #tpu.core_type<tc>, window_params = [{}, {pipeline_mode = #tpu.pipeline_mode<synchronous>, transform_indices = @transform_1, window_bounds = array<i64: 1, 128>}, {pipeline_mode = #tpu.pipeline_mode<synchronous>, transform_indices = @transform_2, window_bounds = array<i64: 1, 128>}, {}]} {
    "tpu.region"() ({
      %24 = tpu.sem_alloc : memref<!tpu.dma_semaphore, #tpu.memory_space<semaphore_mem>>
      tpu.enqueue_dma source(%arg1 : memref<256x128xf32, #tpu.memory_space<any>>) target(%arg5 : memref<256x128xf32, #tpu.memory_space<vmem>>) target_semaphore(%24 : memref<!tpu.dma_semaphore, #tpu.memory_space<semaphore_mem>>)
      tpu.wait_dma2 semaphore(%24 : memref<!tpu.dma_semaphore, #tpu.memory_space<semaphore_mem>>) src(%arg1 : memref<256x128xf32, #tpu.memory_space<any>>) dst(%arg5 : memref<256x128xf32, #tpu.memory_space<vmem>>)
      tpu.yield
    }) : () -> ()
    %c0 = arith.constant 0 : index
    %c0_0 = arith.constant 0 : index
    %0 = vector.load %arg5[%c0, %c0_0] : memref<256x128xf32, #tpu.memory_space<vmem>>, vector<256x128xf32>
    %1 = arith.mulf %0, %0 : vector<256x128xf32>
    %cst = arith.constant dense<0.000000e+00> : vector<128xf32>
    %2 = vector.multi_reduction <add>, %1, %cst [0] : vector<256x128xf32> to vector<128xf32>
    %3 = vector.shape_cast %2 : vector<128xf32> to vector<1x128xf32>
    %4 = math.sqrt %3 : vector<1x128xf32>
    %cst_1 = arith.constant dense<0.000000e+00> : vector<1xf32>
    %5 = vector.multi_reduction <add>, %4, %cst_1 [1] : vector<1x128xf32> to vector<1xf32>
    %6 = vector.shape_cast %5 : vector<1xf32> to vector<1x1xf32>
    %cst_2 = arith.constant 7.812500e-03 : f32
    %7 = vector.broadcast %cst_2 : f32 to vector<1x1xf32>
    %8 = arith.mulf %6, %7 : vector<1x1xf32>
    %cst_3 = arith.constant 9.99999997E-7 : f32
    %9 = vector.broadcast %cst_3 : f32 to vector<1x1xf32>
    %10 = arith.addf %8, %9 : vector<1x1xf32>
    %11 = tpu.reciprocal %10 : vector<1x1xf32> -> vector<1x1xf32>
    %12 = vector.broadcast %11 : vector<1x1xf32> to vector<1x128xf32>
    %13 = arith.mulf %4, %12 : vector<1x128xf32>
    %c0_4 = arith.constant 0 : index
    %c0_5 = arith.constant 0 : index
    %14 = vector.load %arg2[%c0_4, %c0_5] : memref<1x128xf32, #tpu.memory_space<vmem>>, vector<1x128xf32>
    %15 = arith.mulf %14, %13 : vector<1x128xf32>
    %cst_6 = arith.constant 1.000000e+00 : f32
    %16 = vector.broadcast %cst_6 : f32 to vector<1x128xf32>
    %17 = arith.addf %15, %16 : vector<1x128xf32>
    %18 = vector.broadcast %17 : vector<1x128xf32> to vector<256x128xf32>
    %19 = arith.mulf %0, %18 : vector<256x128xf32>
    %c0_7 = arith.constant 0 : index
    %c0_8 = arith.constant 0 : index
    %20 = vector.load %arg3[%c0_7, %c0_8] : memref<1x128xf32, #tpu.memory_space<vmem>>, vector<1x128xf32>
    %21 = vector.broadcast %20 : vector<1x128xf32> to vector<256x128xf32>
    %22 = arith.addf %19, %21 : vector<256x128xf32>
    %c0_9 = arith.constant 0 : index
    %c0_10 = arith.constant 0 : index
    %23 = vector.load %arg5[%c0_9, %c0_10] : memref<256x128xf32, #tpu.memory_space<vmem>>, vector<256x128xf32>
    tpu.vector_store %arg5[%c0_9, %c0_10], %22 {strides = array<i32>} : memref<256x128xf32, #tpu.memory_space<vmem>>, vector<256x128xf32>,
    "tpu.region"() ({
      %24 = tpu.sem_alloc : memref<!tpu.dma_semaphore, #tpu.memory_space<semaphore_mem>>
      tpu.enqueue_dma source(%arg5 : memref<256x128xf32, #tpu.memory_space<vmem>>) target(%arg4 : memref<256x128xf32, #tpu.memory_space<any>>) target_semaphore(%24 : memref<!tpu.dma_semaphore, #tpu.memory_space<semaphore_mem>>)
      tpu.wait_dma2 semaphore(%24 : memref<!tpu.dma_semaphore, #tpu.memory_space<semaphore_mem>>) src(%arg5 : memref<256x128xf32, #tpu.memory_space<vmem>>) dst(%arg4 : memref<256x128xf32, #tpu.memory_space<any>>)
      tpu.yield
    }) : () -> ()
    return
  }
  func.func @transform_1(%arg0: i32) -> (i32, i32) {
    %c0_i32 = arith.constant 0 : i32
    %c0_i32_0 = arith.constant 0 : i32
    %c0_i32_1 = arith.constant 0 : i32
    return %c0_i32, %c0_i32_0 : i32, i32
  }
  func.func @transform_2(%arg0: i32) -> (i32, i32) {
    %c0_i32 = arith.constant 0 : i32
    %c0_i32_0 = arith.constant 0 : i32
    %c0_i32_1 = arith.constant 0 : i32
    return %c0_i32, %c0_i32_0 : i32, i32
  }
}

</mosaic_0001>

<bundles_post_ra>
// kernel: tpu_custom_call.1
= control target key start
LH: loop header
LB: loop body
LE: loop exit
PB: predicated region body
PF: predicated region fallthrough
CT: control target
= control target key end

     0   :  { %s316_s12 = smov [#allocation2]   ;;  %s525_s0 = inlined_call_operand.hbm [shape: f32[256,128], index: 0, kind: input, shape index: {}]   ;;  %s526_s1 = inlined_call_operand.vmem [shape: f32[1,128], index: 1, kind: input, shape index: {}]   ;;  %s527_s2 = inlined_call_operand.vmem [shape: f32[1,128], index: 2, kind: input, shape index: {}]   ;;  %s528_s3 = inlined_call_operand.hbm [shape: f32[256,128], index: 3, kind: output, shape index: {}]  }
   0x1   :  { %s19_s13 = sshll.u32 %s316_s12, 4  ;;  %s337_s13 = int_to_ptr.vmem [resolvable:$true] %s19_s13 }
   0x2   :  { %s280_s14 = scalar_lea.vmem %s337_s13, 4096  ;;  %p285_p1 = scmp.lt.s32.totalorder %s337_s13, %s337_s13 }
   0x3   :  { %p281_p0 = scmp.ne.s32.totalorder %s337_s13, %s280_s14  ;;  %p286_p2 = scmp.lt.s32.totalorder %s280_s14, %s280_s14 }
   0x5   :  { %p287_p3 = por %p286_p2, %p285_p1 }
   0x7   :  { %p343_p4 = pnand %p287_p3, %p281_p0 }
   0x9   :  { %291 = shalt.err (!%p343_p4)  }
   0xa   :  { %22 = dma.hbm_to_vmem [thread:$0]  %s525_s0, 4096, %s337_s13, [#allocation3] }
   0xb   :  { %312 = dma.done.wait [#allocation3], 4096 }
   0xc   :  { %313 = vsyncadd [#allocation3], 4294963200  ;;  %v353_v0 = vld [vmem:[#allocation2] sm:$0xff]  ;;  %v355_v1 = vld [vmem:[#allocation2 + $0x8] sm:$0xff] }
   0xd   :  { %v357_v2 = vld [vmem:[#allocation2 + $0x10] sm:$0xff]  ;;  %v359_v3 = vld [vmem:[#allocation2 + $0x18] sm:$0xff]  ;;  %v58_v4 = vmul.f32 %v353_v0, %v353_v0  ;;  %v59_v5 = vmul.f32 %v355_v1, %v355_v1  ;;  %v367_v7 = vld [vmem:[#allocation2 + $0x20] sm:$0xff] }
   0xe   :  { %v60_v6 = vmul.f32 %v357_v2, %v357_v2  ;;  %v61_v8 = vmul.f32 %v359_v3, %v359_v3  ;;  %v371_v10 = vld [vmem:[#allocation2 + $0x28] sm:$0xff]  ;;  %v62_v11 = vmul.f32 %v367_v7, %v367_v7  ;;  %v375_v13 = vld [vmem:[#allocation2 + $0x30] sm:$0xff]  ;;  %v379_v16 = vld [vmem:[#allocation2 + $0x38] sm:$0xff] }
   0xf   :  { %v90_v9 = vadd.f32 %v59_v5, %v58_v4  ;;  %v63_v14 = vmul.f32 %v371_v10, %v371_v10  ;;  %v64_v17 = vmul.f32 %v375_v13, %v375_v13  ;;  %v383_v19 = vld [vmem:[#allocation2 + $0x40] sm:$0xff]  ;;  %v65_v20 = vmul.f32 %v379_v16, %v379_v16  ;;  %v387_v22 = vld [vmem:[#allocation2 + $0x48] sm:$0xff]  ;;  %v391_v25 = vld [vmem:[#allocation2 + $0x50] sm:$0xff] }
  0x10   :  { %v66_v23 = vmul.f32 %v383_v19, %v383_v19  ;;  %v67_v26 = vmul.f32 %v387_v22, %v387_v22  ;;  %v395_v28 = vld [vmem:[#allocation2 + $0x58] sm:$0xff]  ;;  %v68_v29 = vmul.f32 %v391_v25, %v391_v25  ;;  %v399_v31 = vld [vmem:[#allocation2 + $0x60] sm:$0xff]  ;;  %v403_v34 = vld [vmem:[#allocation2 + $0x68] sm:$0xff] }
  0x11   :  { %v91_v12 = vadd.f32 %v90_v9, %v60_v6  ;;  %v69_v32 = vmul.f32 %v395_v28, %v395_v28  ;;  %v70_v35 = vmul.f32 %v399_v31, %v399_v31  ;;  %v407_v37 = vld [vmem:[#allocation2 + $0x70] sm:$0xff]  ;;  %v71_v38 = vmul.f32 %v403_v34, %v403_v34  ;;  %v411_v40 = vld [vmem:[#allocation2 + $0x78] sm:$0xff]  ;;  %v415_v43 = vld [vmem:[#allocation2 + $0x80] sm:$0xff] }
  0x12   :  { %v72_v41 = vmul.f32 %v407_v37, %v407_v37  ;;  %v73_v44 = vmul.f32 %v411_v40, %v411_v40  ;;  %v419_v46 = vld [vmem:[#allocation2 + $0x88] sm:$0xff]  ;;  %v74_v47 = vmul.f32 %v415_v43, %v415_v43  ;;  %v423_v49 = vld [vmem:[#allocation2 + $0x90] sm:$0xff]  ;;  %v427_v52 = vld [vmem:[#allocation2 + $0x98] sm:$0xff] }
  0x13   :  { %v92_v15 = vadd.f32 %v91_v12, %v61_v8  ;;  %v75_v50 = vmul.f32 %v419_v46, %v419_v46  ;;  %v76_v53 = vmul.f32 %v423_v49, %v423_v49  ;;  %v431_v55 = vld [vmem:[#allocation2 + $0xa0] sm:$0xff]  ;;  %v77_v56 = vmul.f32 %v427_v52, %v427_v52  ;;  %v435_v58 = vld [vmem:[#allocation2 + $0xa8] sm:$0xff]  ;;  %v439_v61 = vld [vmem:[#allocation2 + $0xb0] sm:$0xff] }
  0x14   :  { %v78_v59 = vmul.f32 %v431_v55, %v431_v55  ;;  %v79_v62 = vmul.f32 %v435_v58, %v435_v58  ;;  %v443_v4 = vld [vmem:[#allocation2 + $0xb8] sm:$0xff]  ;;  %v80_v5 = vmul.f32 %v439_v61, %v439_v61  ;;  %v447_v8 = vld [vmem:[#allocation2 + $0xc0] sm:$0xff]  ;;  %v451_v12 = vld [vmem:[#allocation2 + $0xc8] sm:$0xff] }
  0x15   :  { %v93_v18 = vadd.f32 %v92_v15, %v62_v11  ;;  %v81_v9 = vmul.f32 %v443_v4, %v443_v4 }
  0x17   :  { %v94_v21 = vadd.f32 %v93_v18, %v63_v14  ;;  %v82_v14 = vmul.f32 %v447_v8, %v447_v8  ;;  %v83_v18 = vmul.f32 %v451_v12, %v451_v12 }
  0x19   :  { %v95_v24 = vadd.f32 %v94_v21, %v64_v17  ;;  %v455_v17 = vld [vmem:[#allocation2 + $0xd0] sm:$0xff]  ;;  %v459_v21 = vld [vmem:[#allocation2 + $0xd8] sm:$0xff] }
  0x1b   :  { %v96_v27 = vadd.f32 %v95_v24, %v65_v20 }
  0x1d   :  { %v97_v30 = vadd.f32 %v96_v27, %v66_v23  ;;  %v84_v23 = vmul.f32 %v455_v17, %v455_v17  ;;  %v85_v27 = vmul.f32 %v459_v21, %v459_v21 }
  0x1f   :  { %v98_v33 = vadd.f32 %v97_v30, %v67_v26  ;;  %v463_v26 = vld [vmem:[#allocation2 + $0xe0] sm:$0xff]  ;;  %v467_v30 = vld [vmem:[#allocation2 + $0xe8] sm:$0xff] }
  0x21   :  { %v99_v36 = vadd.f32 %v98_v33, %v68_v29 }
  0x23   :  { %v100_v39 = vadd.f32 %v99_v36, %v69_v32  ;;  %v86_v32 = vmul.f32 %v463_v26, %v463_v26  ;;  %v87_v36 = vmul.f32 %v467_v30, %v467_v30 }
  0x25   :  { %v101_v42 = vadd.f32 %v100_v39, %v70_v35  ;;  %v471_v35 = vld [vmem:[#allocation2 + $0xf0] sm:$0xff]  ;;  %v475_v39 = vld [vmem:[#allocation2 + $0xf8] sm:$0xff] }
  0x27   :  { %v102_v45 = vadd.f32 %v101_v42, %v71_v38 }
  0x29   :  { %v103_v48 = vadd.f32 %v102_v45, %v72_v41  ;;  %v88_v41 = vmul.f32 %v471_v35, %v471_v35 }
  0x2b   :  { %v104_v51 = vadd.f32 %v103_v48, %v73_v44  ;;  %v89_v44 = vmul.f32 %v475_v39, %v475_v39 }
  0x2d   :  { %v105_v54 = vadd.f32 %v104_v51, %v74_v47 }
  0x2f   :  { %v106_v57 = vadd.f32 %v105_v54, %v75_v50 }
  0x31   :  { %v107_v60 = vadd.f32 %v106_v57, %v76_v53 }
  0x33   :  { %v108_v63 = vadd.f32 %v107_v60, %v77_v56 }
  0x35   :  { %v109_v6 = vadd.f32 %v108_v63, %v78_v59 }
  0x37   :  { %v110_v11 = vadd.f32 %v109_v6, %v79_v62 }
  0x39   :  { %v111_v15 = vadd.f32 %v110_v11, %v80_v5 }
  0x3b   :  { %v112_v20 = vadd.f32 %v111_v15, %v81_v9 }
  0x3d   :  { %v113_v24 = vadd.f32 %v112_v20, %v82_v14  ;;  %v144_v14 = vlaneseq  ;;  %v140_v20 = vld [vmem:[%s526_s1] sm:$0x1] }
  0x3f   :  { %v114_v29 = vadd.f32 %v113_v24, %v83_v18  ;;  %v145_v15 = vshrl.u32 %v144_v14, 7 }
  0x41   :  { %v115_v33 = vadd.f32 %v114_v29, %v84_v23 }
  0x43   :  { %v116_v38 = vadd.f32 %v115_v33, %v85_v27  ;;  %v146_v27 = vsub.s32 0, %v145_v15 }
  0x45   :  { %v117_v42 = vadd.f32 %v116_v38, %v86_v32 }
  0x47   :  { %v118_v45 = vadd.f32 %v117_v42, %v87_v36 }
  0x49   :  { %v119_v47 = vadd.f32 %v118_v45, %v88_v41 }
  0x4b   :  { %v120_v48 = vadd.f32 %v119_v47, %v89_v44 }
  0x4d   :  { %v121_v50 = vrot.slane %v120_v48, 4 }
  0x4f   :  { %v122_v51 = vadd.f32 %v121_v50, %v120_v48 }
  0x51   :  { %v123_v53 = vrot.slane %v122_v51, 2 }
  0x53   :  { %v124_v54 = vadd.f32 %v123_v53, %v122_v51 }
  0x55   :  { %v125_v56 = vrot.slane %v124_v54, 1 }
  0x57   :  { %v126_v57 = vadd.f32 %v125_v56, %v124_v54 }
  0x59   :  { %268 = vrsqrt.f32 %v126_v57  ;;  %vm129_vm0 = vcmp.eq.f32.partialorder %v126_v57, inf  ;;  %v132_v60 = vand.u32 2147483648, %v126_v57  ;;  %vm131_vm1 = vcmp.eq.f32.partialorder %v126_v57, 0.0 }
  0x66   :  { %v269_v59 = vpop.eup %268 }
  0x67   :  { %v128_v62 = vmul.f32 %v269_v59, %v126_v57 }
  0x69   :  { %v130_v63 = vsel %vm129_vm0, %v126_v57, %v128_v62 }
  0x6a   :  { %v133_v5 = vsel %vm131_vm1, %v132_v60, %v130_v63 }
  0x6b   :  { %134 = vadd.xlane.f32.xlu0 %v133_v5 }
  0xf4   :  { %v135_v6 = vpop.xlane.xlu0 %134 }
  0xf5   :  { %v136_v9 = vmul.f32 0.0078125, %v135_v6 }
  0xf7   :  { %v137_v11 = vadd.f32 1e-06, %v136_v9 }
  0xf9   :  { %270 = vrcp.f32 %v137_v11 }
 0x106   :  { %v271_v18 = vpop.eup %270 }
 0x107   :  { %v139_v23 = vmul.f32 %v271_v18, %v133_v5 }
 0x109   :  { %v141_v24 = vmul.f32 %v140_v20, %v139_v23 }
 0x10b   :  { %v142_v29 = vadd.f32 1.0, %v141_v24 }
 0x10d   :  { %v147_v32 = vrot.slane %v142_v29, %v146_v27 }
 0x10f   :  { %v149_v33 = vmul.f32 %v147_v32, %v353_v0  ;;  %v150_v36 = vmul.f32 %v147_v32, %v355_v1  ;;  %v151_v38 = vmul.f32 %v147_v32, %v357_v2  ;;  %v152_v41 = vmul.f32 %v147_v32, %v359_v3 }
 0x110   :  { %v153_v42 = vmul.f32 %v147_v32, %v367_v7  ;;  %v154_v44 = vmul.f32 %v147_v32, %v371_v10  ;;  %v155_v45 = vmul.f32 %v147_v32, %v375_v13  ;;  %v156_v47 = vmul.f32 %v147_v32, %v379_v16 }
 0x111   :  { %v157_v48 = vmul.f32 %v147_v32, %v383_v19  ;;  %v158_v50 = vmul.f32 %v147_v32, %v387_v22  ;;  %v159_v0 = vmul.f32 %v147_v32, %v391_v25  ;;  %v160_v1 = vmul.f32 %v147_v32, %v395_v28 }
 0x112   :  { %v161_v2 = vmul.f32 %v147_v32, %v399_v31  ;;  %v162_v3 = vmul.f32 %v147_v32, %v403_v34  ;;  %v163_v7 = vmul.f32 %v147_v32, %v407_v37  ;;  %v164_v10 = vmul.f32 %v147_v32, %v411_v40  ;;  %v266_v37 = vld [vmem:[%s527_s2] ss:$0 sm:$0xff] }
 0x113   :  { %v165_v13 = vmul.f32 %v147_v32, %v415_v43  ;;  %v166_v16 = vmul.f32 %v147_v32, %v419_v46  ;;  %v167_v19 = vmul.f32 %v147_v32, %v423_v49  ;;  %v168_v22 = vmul.f32 %v147_v32, %v427_v52 }
 0x114   :  { %v169_v25 = vmul.f32 %v147_v32, %v431_v55  ;;  %v170_v28 = vmul.f32 %v147_v32, %v435_v58  ;;  %v171_v31 = vmul.f32 %v147_v32, %v439_v61  ;;  %v172_v34 = vmul.f32 %v147_v32, %v443_v4 }
 0x115   :  { %v173_v40 = vmul.f32 %v147_v32, %v447_v8  ;;  %v174_v43 = vmul.f32 %v147_v32, %v451_v12  ;;  %v175_v46 = vmul.f32 %v147_v32, %v455_v17  ;;  %v176_v49 = vmul.f32 %v147_v32, %v459_v21 }
 0x116   :  { %v177_v52 = vmul.f32 %v147_v32, %v463_v26  ;;  %v178_v55 = vmul.f32 %v147_v32, %v467_v30  ;;  %v179_v58 = vmul.f32 %v147_v32, %v471_v35  ;;  %v180_v61 = vmul.f32 %v147_v32, %v475_v39 }
 0x117   :  { %v188_v4 = vadd.f32 %v266_v37, %v149_v33  ;;  %v189_v51 = vadd.f32 %v266_v37, %v150_v36  ;;  %v190_v53 = vadd.f32 %v266_v37, %v151_v38  ;;  %v191_v54 = vadd.f32 %v266_v37, %v152_v41 }
 0x118   :  { %v192_v56 = vadd.f32 %v266_v37, %v153_v42  ;;  %v193_v8 = vadd.f32 %v266_v37, %v154_v44  ;;  %v194_v57 = vadd.f32 %v266_v37, %v155_v45  ;;  %v195_v12 = vadd.f32 %v266_v37, %v156_v47 }
 0x119   :  { %v196_v59 = vadd.f32 %v266_v37, %v157_v48  ;;  %v197_v17 = vadd.f32 %v266_v37, %v158_v50  ;;  %v198_v60 = vadd.f32 %v266_v37, %v159_v0  ;;  %v199_v21 = vadd.f32 %v266_v37, %v160_v1  ;;  %220 = vst [vmem:[#allocation2] sm:$0xff] %v188_v4 }
 0x11a   :  { %221 = vst [vmem:[#allocation2 + $0x8] sm:$0xff] %v189_v51  ;;  %222 = vst [vmem:[#allocation2 + $0x10] sm:$0xff] %v190_v53  ;;  %v200_v26 = vadd.f32 %v266_v37, %v161_v2  ;;  %v201_v30 = vadd.f32 %v266_v37, %v162_v3  ;;  %v202_v35 = vadd.f32 %v266_v37, %v163_v7 }
 0x11b   :  { %223 = vst [vmem:[#allocation2 + $0x18] sm:$0xff] %v191_v54  ;;  %v203_v39 = vadd.f32 %v266_v37, %v164_v10  ;;  %224 = vst [vmem:[#allocation2 + $0x20] sm:$0xff] %v192_v56  ;;  %v204_v62 = vadd.f32 %v266_v37, %v165_v13  ;;  %v205_v63 = vadd.f32 %v266_v37, %v166_v16 }
 0x11c   :  { %225 = vst [vmem:[#allocation2 + $0x28] sm:$0xff] %v193_v8  ;;  %226 = vst [vmem:[#allocation2 + $0x30] sm:$0xff] %v194_v57  ;;  %v206_v5 = vadd.f32 %v266_v37, %v167_v19  ;;  %v207_v6 = vadd.f32 %v266_v37, %v168_v22  ;;  %v208_v9 = vadd.f32 %v266_v37, %v169_v25 }
 0x11d   :  { %227 = vst [vmem:[#allocation2 + $0x38] sm:$0xff] %v195_v12  ;;  %228 = vst [vmem:[#allocation2 + $0x40] sm:$0xff] %v196_v59  ;;  %v209_v11 = vadd.f32 %v266_v37, %v170_v28  ;;  %v210_v14 = vadd.f32 %v266_v37, %v171_v31  ;;  %v211_v15 = vadd.f32 %v266_v37, %v172_v34 }
 0x11e   :  { %229 = vst [vmem:[#allocation2 + $0x48] sm:$0xff] %v197_v17  ;;  %230 = vst [vmem:[#allocation2 + $0x50] sm:$0xff] %v198_v60  ;;  %v212_v18 = vadd.f32 %v266_v37, %v173_v40  ;;  %v213_v20 = vadd.f32 %v266_v37, %v174_v43  ;;  %v214_v23 = vadd.f32 %v266_v37, %v175_v46 }
 0x11f   :  { %231 = vst [vmem:[#allocation2 + $0x58] sm:$0xff] %v199_v21  ;;  %232 = vst [vmem:[#allocation2 + $0x60] sm:$0xff] %v200_v26  ;;  %v215_v24 = vadd.f32 %v266_v37, %v176_v49  ;;  %v216_v27 = vadd.f32 %v266_v37, %v177_v52  ;;  %v217_v29 = vadd.f32 %v266_v37, %v178_v55 }
 0x120   :  { %233 = vst [vmem:[#allocation2 + $0x68] sm:$0xff] %v201_v30  ;;  %234 = vst [vmem:[#allocation2 + $0x70] sm:$0xff] %v202_v35  ;;  %v218_v32 = vadd.f32 %v266_v37, %v179_v58  ;;  %v219_v33 = vadd.f32 %v266_v37, %v180_v61 }
 0x121   :  { %235 = vst [vmem:[#allocation2 + $0x78] sm:$0xff] %v203_v39  ;;  %236 = vst [vmem:[#allocation2 + $0x80] sm:$0xff] %v204_v62 }
 0x122   :  { %237 = vst [vmem:[#allocation2 + $0x88] sm:$0xff] %v205_v63  ;;  %238 = vst [vmem:[#allocation2 + $0x90] sm:$0xff] %v206_v5 }
 0x123   :  { %239 = vst [vmem:[#allocation2 + $0x98] sm:$0xff] %v207_v6  ;;  %240 = vst [vmem:[#allocation2 + $0xa0] sm:$0xff] %v208_v9 }
 0x124   :  { %241 = vst [vmem:[#allocation2 + $0xa8] sm:$0xff] %v209_v11  ;;  %242 = vst [vmem:[#allocation2 + $0xb0] sm:$0xff] %v210_v14 }
 0x125   :  { %243 = vst [vmem:[#allocation2 + $0xb8] sm:$0xff] %v211_v15  ;;  %244 = vst [vmem:[#allocation2 + $0xc0] sm:$0xff] %v212_v18 }
 0x126   :  { %245 = vst [vmem:[#allocation2 + $0xc8] sm:$0xff] %v213_v20  ;;  %246 = vst [vmem:[#allocation2 + $0xd0] sm:$0xff] %v214_v23 }
 0x127   :  { %247 = vst [vmem:[#allocation2 + $0xd8] sm:$0xff] %v215_v24  ;;  %248 = vst [vmem:[#allocation2 + $0xe0] sm:$0xff] %v216_v27 }
 0x128   :  { %249 = vst [vmem:[#allocation2 + $0xe8] sm:$0xff] %v217_v29  ;;  %250 = vst [vmem:[#allocation2 + $0xf0] sm:$0xff] %v218_v32 }
 0x129   :  { %251 = vst [vmem:[#allocation2 + $0xf8] sm:$0xff] %v219_v33 }
 0x12a   :  { %303 = shalt.err (!%p343_p4)  }
 0x12b   :  { %262 = dma.vmem_to_hbm [thread:$0]  %s337_s13, 4096, %s528_s3, [#allocation8] }
 0x12c   :  { %314 = dma.done.wait [#allocation8], 4096 }
 0x12d   :  { %315 = vsyncadd [#allocation8], 4294963200 }

</bundles_post_ra>
